<compile_context>
chip_gen: v6e
topology: v6e:2x2x1
jax: 0.10.0
libtpu: 0.0.40
codegen_flags: <defaults>
</compile_context>

<pallas_src>
import jax
import jax.numpy as jnp
from jax.experimental import pallas as pl
from jax.experimental.pallas import tpu as pltpu


def _round_up(x, m):
    return ((x + m - 1) // m) * m


def _basic_lr_kernel(x_ref, w_ref, b_ref, o_ref):
    # x_ref: (TB, F) VMEM (streamed), w_ref: (1, F) VMEM (resident), b_ref: (1,) SMEM.
    x = x_ref[...].astype(jnp.float32)
    w = w_ref[...].astype(jnp.float32)
    # VPU broadcast multiply + XLU lane reduce; avoids the MXU for the F -> 1 contraction.
    z = jnp.sum(x * w, axis=-1, keepdims=True)             # (TB, 1)
    z = z + b_ref[0]                                        # scalar bias from SMEM
    # exp() runs on the EUP; exact divide keeps full f32 precision.
    out = 1.0 / (1.0 + jnp.exp(-z))
    o_ref[...] = out.astype(o_ref.dtype)


def basic_lr_forward(x, weight, bias, *, block_b=512, vmem_limit_bytes=None):
    """BasicLR forward pass.

    x:      (B, F) activations.
    weight: (1, F)  -- torch.nn.Linear(F, 1).weight layout.
    bias:   (1,)    -- torch.nn.Linear(F, 1).bias layout.
    returns (B, 1) = sigmoid(x @ weight.T + bias)
    """
    B, F = x.shape
    weight = weight.reshape(1, F).astype(jnp.float32)
    bias = bias.reshape(1).astype(jnp.float32)

    itemsize = x.dtype.itemsize
    # Lane-padded footprint of one x tile row (F rounds up to 128 lanes in VMEM).
    f_pad = max(_round_up(F, 128), 128)

    # Batch tile: multiple of 8 sublanes, as large as the VMEM budget allows but
    # auto-capped so 2 double-buffered x tiles fit a ~24 MiB working budget
    # (safe on v5e/v6e's 128 MiB and v7x's 64 MiB physical VMEM).
    x_tile_budget = 24 * 1024 * 1024
    tb_cap = max(8, (x_tile_budget // (2 * f_pad * itemsize)) // 8 * 8)
    tb = min(block_b, tb_cap, _round_up(B, 8))
    tb = max(8, _round_up(tb, 8))

    b_pad = _round_up(B, tb)
    if b_pad != B:
        # Padded rows just produce sigmoid(bias); they are sliced off below.
        x = jnp.pad(x, ((0, b_pad - B), (0, 0)))

    if vmem_limit_bytes is None:
        # double-buffered x tile + double-buffered out tile + resident weight + slack
        need = 2 * tb * f_pad * itemsize + 2 * tb * 128 * 4 + f_pad * 4 + (2 << 20)
        vmem_limit_bytes = int(min(max(need, 16 * 1024 * 1024), 64 * 1024 * 1024))

    out = pl.pallas_call(
        _basic_lr_kernel,
        out_shape=jax.ShapeDtypeStruct((b_pad, 1), x.dtype),
        grid=(b_pad // tb,),
        in_specs=[
            pl.BlockSpec((tb, F), lambda i: (i, 0)),            # x: streamed per batch tile
            pl.BlockSpec((1, F), lambda i: (0, 0)),             # weight row: VMEM-resident
            pl.BlockSpec(memory_space=pltpu.MemorySpace.SMEM),  # bias: scalar in SMEM
        ],
        out_specs=pl.BlockSpec((tb, 1), lambda i: (i, 0)),
        compiler_params=pltpu.CompilerParams(
            dimension_semantics=("parallel",),   # lets v7x shard batch tiles over 2 TCs
            vmem_limit_bytes=vmem_limit_bytes,
        ),
    )(x, weight, bias)
    return out[:B]


if __name__ == "__main__":
    batch = 20
    n_features = 32

    key = jax.random.PRNGKey(0)
    kx, kw, kb = jax.random.split(key, 3)

    # Deterministic synthetic parameters (shapes from torch.nn.Linear(n_features, 1)).
    bound = 1.0 / float(n_features) ** 0.5
    x = jax.random.normal(kx, (batch, n_features), dtype=jnp.float32)
    w = jax.random.uniform(kw, (1, n_features), dtype=jnp.float32, minval=-bound, maxval=bound)
    b = jax.random.uniform(kb, (1,), dtype=jnp.float32, minval=-bound, maxval=bound)

    ref = jax.nn.sigmoid(x @ w.T + b)

    # Small block_b exercises the multi-tile grid + ragged-batch padding path.
    out = jax.block_until_ready(basic_lr_forward(x, w, b, block_b=8))
    assert out.shape == (batch, 1)
    assert jnp.allclose(out, ref, atol=1e-5, rtol=1e-5)

    # Default (single-tile at this toy size) configuration.
    out2 = jax.block_until_ready(basic_lr_forward(x, w, b))
    assert jnp.allclose(out2, ref, atol=1e-5, rtol=1e-5)

    print("KERNEL_OK")
</pallas_src>

<mosaic_0001>
module attributes {stable_mosaic.version = 11 : i64} {
  func.func @_basic_lr_kernel(%arg0: i32, %arg1: memref<8x32xf32, #tpu.memory_space<vmem>>, %arg2: memref<1x32xf32, #tpu.memory_space<vmem>>, %arg3: memref<1xf32, #tpu.memory_space<smem>>, %arg4: memref<8x1xf32, #tpu.memory_space<vmem>>) attributes {dimension_semantics = [#tpu.dimension_semantics<parallel>], iteration_bounds = array<i64: 3>, scalar_prefetch = 0 : i64, scratch_operands = 0 : i64, tpu.core_type = #tpu.core_type<tc>, window_params = [{transform_indices = @transform_0, window_bounds = array<i64: 8, 32>}, {pipeline_mode = #tpu.pipeline_mode<synchronous>, transform_indices = @transform_1, window_bounds = array<i64: 1, 32>}, {transform_indices = @transform_2, window_bounds = array<i64: 1>}, {transform_indices = @transform_3, window_bounds = array<i64: 8, 1>}]} {
    %c0 = arith.constant 0 : index
    %c0_0 = arith.constant 0 : index
    %0 = vector.load %arg1[%c0, %c0_0] : memref<8x32xf32, #tpu.memory_space<vmem>>, vector<8x32xf32>
    %c0_1 = arith.constant 0 : index
    %c0_2 = arith.constant 0 : index
    %1 = vector.load %arg2[%c0_1, %c0_2] : memref<1x32xf32, #tpu.memory_space<vmem>>, vector<1x32xf32>
    %2 = vector.broadcast %1 : vector<1x32xf32> to vector<8x32xf32>
    %3 = arith.mulf %0, %2 : vector<8x32xf32>
    %cst = arith.constant dense<0.000000e+00> : vector<8xf32>
    %4 = vector.multi_reduction <add>, %3, %cst [1] : vector<8x32xf32> to vector<8xf32>
    %5 = vector.shape_cast %4 : vector<8xf32> to vector<8x1xf32>
    %c0_3 = arith.constant 0 : index
    %6 = memref.load %arg3[%c0_3] : memref<1xf32, #tpu.memory_space<smem>>
    %7 = vector.broadcast %6 : f32 to vector<8x1xf32>
    %8 = arith.addf %5, %7 : vector<8x1xf32>
    %cst_4 = arith.constant 0.000000e+00 : f32
    %9 = vector.broadcast %cst_4 : f32 to vector<8x1xf32>
    %10 = arith.subf %9, %8 : vector<8x1xf32>
    %11 = math.exp %10 : vector<8x1xf32>
    %cst_5 = arith.constant 1.000000e+00 : f32
    %12 = vector.broadcast %cst_5 : f32 to vector<8x1xf32>
    %13 = arith.addf %12, %11 : vector<8x1xf32>
    %cst_6 = arith.constant 1.000000e+00 : f32
    %14 = vector.broadcast %cst_6 : f32 to vector<8x1xf32>
    %15 = arith.divf %14, %13 : vector<8x1xf32>
    %c0_7 = arith.constant 0 : index
    %c0_8 = arith.constant 0 : index
    %16 = vector.load %arg4[%c0_7, %c0_8] : memref<8x1xf32, #tpu.memory_space<vmem>>, vector<8x1xf32>
    tpu.vector_store %arg4[%c0_7, %c0_8], %15 {strides = array<i32>} : memref<8x1xf32, #tpu.memory_space<vmem>>, vector<8x1xf32>,
    return
  }
  func.func @transform_0(%arg0: i32) -> (i32, i32) {
    %c0_i32 = arith.constant 0 : i32
    %c0_i32_0 = arith.constant 0 : i32
    return %arg0, %c0_i32 : i32, i32
  }
  func.func @transform_1(%arg0: i32) -> (i32, i32) {
    %c0_i32 = arith.constant 0 : i32
    %c0_i32_0 = arith.constant 0 : i32
    %c0_i32_1 = arith.constant 0 : i32
    return %c0_i32, %c0_i32_0 : i32, i32
  }
  func.func @transform_2(%arg0: i32) -> i32 {
    %c0_i32 = arith.constant 0 : i32
    %c0_i32_0 = arith.constant 0 : i32
    return %c0_i32 : i32
  }
  func.func @transform_3(%arg0: i32) -> (i32, i32) {
    %c0_i32 = arith.constant 0 : i32
    %c0_i32_0 = arith.constant 0 : i32
    return %arg0, %c0_i32 : i32, i32
  }
}

</mosaic_0001>

<bundles_post_ra>
// kernel: tpu_custom_call.1
= control target key start
LH: loop header
LB: loop body
LE: loop exit
PB: predicated region body
PF: predicated region fallthrough
CT: control target
= control target key end

     0   :  { %s521_s0 = inlined_call_operand.hbm [shape: f32[24,32], index: 0, kind: input, shape index: {}]   ;;  %s522_s1 = inlined_call_operand.vmem [shape: f32[1,32], index: 1, kind: input, shape index: {}]   ;;  %s523_s2 = inlined_call_operand.<no memory space> [shape: f32[1], index: 2, kind: input, shape index: {}]   ;;  %s524_s3 = inlined_call_operand.vmem [shape: f32[24,1], index: 3, kind: output, shape index: {}]  }
   0x1   :  { %8 = sst [smem:[#allocation2]] %s523_s2 }
   0x2   :  { %9 = vsyncpa [#allocation4], 0 }
   0x3   :  { %11 = vsyncpa [#allocation4 + $0x1], 0  ;;  %s418_s14 = smov 0   ;;  %s420_s15 = smov 0  }
   0x4   :  { %s422_s16 = smov 0   ;;  %s424_s17 = smov 0  }
   0x5 LB: > { %s437_s2 = sadd.s32 4294967295, %s392_s17   ;;  %s440_s18 = sadd.s32 1, %s392_s17   ;;  %s392_s17 = sphi %s424_s17, %s534_s17   ;;  %s388_s16 = sphi %s422_s16, %s533_s16   ;;  %s384_s15 = sphi %s420_s15, %s532_s15   ;;  %s380_s14 = sphi %s418_s14, %s531_s14  }
   0x6   : > { %s21_s19 = ssub.s32 %s392_s17, %s440_s18  ;;  %s24_s20 = sadd.s32 1, %s388_s16 }
   0x7   : > { %p22_p0 = scmp.eq.s32.totalorder %s21_s19, 0  ;;  %p31_p1 = scmp.ne.s32.totalorder %s388_s16, %s384_s15 }
   0x8   : > { %p32_p2 = scmp.eq.s32.totalorder %s392_s17, 0  ;;  %p37_p3 = scmp.ne.s32.totalorder %s384_s15, %s380_s14 }
   0x9   : > { %s450_s21 = scalar_select %p22_p0, %s388_s16, %s24_s20  }
   0xa   : > { %p33_p4 = por %p32_p2, %p31_p1  ;;  %p38_p5 = scmp.eq.s32.totalorder %s437_s2, 0 }
   0xb   : > { %p293_p6 = scmp.lt.s32.totalorder %s392_s17, 3  ;;  %s135_s23 = sand.u32 1, %s388_s16  }
   0xc   : > { %p454_p7 = por %p38_p5, %p37_p3  ;;  %s279_s24 = sshll.u32 %s135_s23, 3 }
   0xd   : > { %s280_s25 = sshll.u32 %s392_s17, 7  ;;  %s139_s29 = scalar_lea.vmem [#allocation3], %s279_s24 }
   0xe   : > { %s526_s22 = scalar_select %p454_p7, 1, 0 }
   0xf   : > { %s463_s28 = scalar_lea.hbm %s521_s0, %s280_s25  ;;  %s146_s30 = sshll.u32 %s139_s29, 4  ;;  %s465_s30 = int_to_ptr.vmem [resolvable:$true] %s146_s30 }
  0x10   : > { %p467_p8 = pnand %p293_p6, %p33_p4  ;;  %s136_s5 = scalar_lea.sflag [#allocation4], %s135_s23 }
  0x11   : > { %s330_s6 = scalar_lea.hbm %s463_s28, 128  ;;  %s335_s9 = scalar_lea.hbm %s521_s0, 384 }
  0x12   : > { %p331_p11 = scmp.ne.s32.totalorder %s463_s28, %s330_s6  ;;  %p332_p12 = pneg %p467_p8 }
  0x13   : > { %p336_p1 = scmp.lt.s32.totalorder %s463_s28, %s521_s0  ;;  %p337_p2 = scmp.lt.s32.totalorder %s335_s9, %s330_s6 }
  0x14   : > { %p333_p13 = pnand %p332_p12, %p331_p11 }
  0x15   : > { %p338_p3 = por %p337_p2, %p336_p1 }
  0x16   : > { %p334_p0 = pneg %p333_p13 }
  0x18   : > { %p339_p4 = pnand %p338_p3, %p334_p0 }
  0x1a   : > { %342 = shalt.err (!%p339_p4)
}
  0x1b   : > { %s343_s12 = scalar_lea.vmem %s465_s30, 128  ;;  %s394_s13 = smov [#allocation3]  }
  0x1c   : > { %p344_p5 = scmp.ne.s32.totalorder %s465_s30, %s343_s12  ;;  %s348_s14 = sshll.u32 %s394_s13, 4  ;;  %s349_s14 = int_to_ptr.vmem [resolvable:$false] %s348_s14 }
  0x1d   : > { %s350_s19 = scalar_lea.vmem %s349_s14, 256  ;;  %p351_p13 = scmp.lt.s32.totalorder %s465_s30, %s349_s14 }
  0x1e   : > { %p346_p6 = pnand %p344_p5, %p332_p12  ;;  %p352_p9 = scmp.lt.s32.totalorder %s350_s19, %s343_s12 }
  0x20   : > { %p347_p11 = pneg %p346_p6  ;;  %p353_p10 = por %p352_p9, %p351_p13 }
  0x22   : > { %p354_p7 = pnand %p353_p10, %p347_p11 }
  0x24   : > { %357 = shalt.err (!%p354_p7)
}
  0x25   : > { %292 = dma.hbm_to_vmem [thread:$0]  (!%p467_p8), %s463_s28, 128, %s465_s30, %s136_s5  }
  0x26   : > { %p528_p0 = scmp.lt.s32.totalorder %s392_s17, 4  ;;  %p529_p1 = scmp.ge.s32.totalorder %s392_s17, 1 }
  0x28   : > { %p152_p12 = pnand %p529_p1, %p528_p0 }
  0x29   : > { %s157_s20 = sand.u32 (!%p152_p12), 1, %s384_s15   ;;  %p530_p9 = scmp.ne.s32.totalorder (!%p152_p12), %s526_s22, 0 }
  0x2a   : > { %155 = sbr.rel (%p152_p12) target bundleno = 228 (0xe4), region = 32  ;;  %s282_s23 = sshll.u32 (!%p152_p12), %s157_s20, 3 }
  0x2b   : > { %s158_s24 = scalar_lea.sflag (!%p152_p12), [#allocation4], %s157_s20  ;;  %s161_s25 = scalar_lea.vmem (!%p152_p12), [#allocation3], %s282_s23 }
  0x2f   : > { %375 = dma.done.wait (%p530_p9), %s158_s24, 128  }
  0x30   : > { %377 = vsyncadd (%p530_p9), %s158_s24, 4294967168  ;;  %v187_v0 = vld [vmem:[%s161_s25] sm:$0xff]  ;;  %vm196_vm0 = vcmask 261120   ;;  %s200_s17 = sld [smem:[#allocation2]]  ;;  %p183_p7 = scmp.lt.s32.totalorder %s437_s2, 2  ;;  %vm209_vm1 = vcmask 7168  }
  0x31   : > { %v284_v1 = vld [vmem:[%s522_s1] ss:$0 sm:$0xff] }
  0x32   : > { %v195_v2 = vmul.f32 %v284_v1, %v187_v0  ;;  %s536_s2 = smov (!%p183_p7, %s437_s2), 2 }
  0x33   : > { %s283_s22 = sshll.u32 %s536_s2, 3 }
  0x34   : > { %v197_v3 = vsel %vm196_vm0, %v195_v2, 0.0  ;;  %s186_s30 = scalar_lea.vmem %s524_s3, %s283_s22 }
  0x35   : > { %198 = vadd.xlane.f32.xlu0 %v197_v3 }
  0x36   : > { %v201_v4 = vstv %s200_s17 }
  0xbe   : > { %v199_v5 = vpop.xlane.xlu0 %198 }
  0xbf   : > { %v202_v6 = vadd.f32 %v201_v4, %v199_v5 }
  0xc1   : > { %v203_v7 = vsub.f32 0.0, %v202_v6 }
  0xc3   : > { %v204_v8 = vmul.f32 1.442695, %v203_v7 }
  0xc5   : > { %326 = vpow2.f32 %v204_v8 }
  0xd2   : > { %v327_v9 = vpop.eup %326 }
  0xd3   : > { %v206_v10 = vadd.f32 1.0, %v327_v9 }
  0xd5   : > { %328 = vrcp.f32 %v206_v10 }
  0xe2   : > { %v329_v11 = vpop.eup %328 }
  0xe3   : > { %210 = vst.msk [vmem:[%s186_s30] sm:$0xff] %vm209_vm1, %v329_v11 }
  0xe4 PF: > { %p14_p8 = scmp.ge.s32.totalorder %s440_s18, 5   ;;  %s531_s14 = smov %s384_s15 }
  0xe5   : > { %s532_s15 = smov %s388_s16  ;;  %s533_s16 = smov %s450_s21 }
  0xe6   : > { %s534_s17 = smov %s440_s18  ;;  %16 = sbr.rel (!%p14_p8) target bundleno = 5 (0x5), region = 72 }
  0xeb   :  { %230 = vsyncpa [#allocation4], 1 }
  0xec   :  { %232 = vsyncpa [#allocation4 + $0x1], 1 }

</bundles_post_ra>
